<compile_context>
chip_gen: v5e
topology: v5e:2x2
jax: 0.10.0
libtpu: 0.0.40
codegen_flags: <defaults>
</compile_context>

<pallas_src>
import functools
import math

import numpy as np
import jax
import jax.numpy as jnp
from jax import lax
from jax.experimental import pallas as pl
from jax.experimental.pallas import tpu as pltpu


def _pair(v):
    if isinstance(v, (tuple, list)):
        return tuple(v)
    return (v, v)


def _round_up(v, m):
    return (v + m - 1) // m * m


def _vmem_limit_bytes():
    """Generation-aware VMEM limit (v5e/v6e: 128 MiB physical, v7x: 64 MiB)."""
    cap = 64 * 1024 * 1024                 # conservative default (v7x per-core)
    try:
        info = pltpu.get_tpu_info()
        cap = int(getattr(info, "vmem_capacity_bytes", cap)) or cap
    except Exception:
        pass
    return int(min(0.70 * cap, 96 * 1024 * 1024))


def _choose_q_tile(q, hw, h, w, k, cout, op_bytes, vmem_limit, max_tq):
    """Largest 128-multiple Q tile whose per-step working set fits VMEM."""
    co_pad = _round_up(cout, 32 // op_bytes)       # sublane-padded A rows
    hw_pad = _round_up(hw, 128)
    a_block = 2 * k * co_pad * hw_pad * op_bytes   # double-buffered A block
    budget = int(0.80 * vmem_limit) - a_block
    if budget <= 128 * 1024:
        # TODO(synk): stream A per tap via a K grid axis for very large images.
        raise ValueError(
            f"reassociated weights A ({a_block} B double-buffered) do not fit "
            f"the VMEM budget ({vmem_limit} B)")
    per_col = (h * _round_up(w, 8) * 4   # (H, W, TQ) f32 tent product
               + hw_pad * op_bytes       # matmul-dtype copy of the tent
               + 8 * h * 4               # (H, 1, TQ) sublane-padded ty
               + _round_up(w, 8) * 4     # (W, TQ) tx
               + 3 * co_pad * 4          # acc scratch + double-buffered out
               + 2 * k * 8 * 4           # double-buffered offsets block
               + 2 * 8 * 4)              # double-buffered base block
    tq = max(128, budget // per_col // 128 * 128)
    return int(max(128, min(tq, max_tq, _round_up(q, 128))))


# ----------------------------------------------------------------------------
# Pallas kernel: one grid step per (image, Q-tile).
# ----------------------------------------------------------------------------
def _deform_conv_kernel(base_ref, hrow_ref, off_ref, a_ref, b_ref, o_ref,
                        acc_ref, *, kh, kw, dil_h, dil_w, h, w, matmul_dtype):
    """One (image, Q-tile) step of the reassociated deformable convolution.

    base_ref: (2, TQ)       f32   row 0: ho*sh - ph, row 1: wo*sw - pw
    hrow_ref: (H, 1, 1)     f32   static pixel-row indices 0..H-1
    off_ref:  (K, 2, TQ)    f32   learned offsets (row 0: dy, row 1: dx)
    a_ref:    (K, Co, HW)   mm    reassociated per-tap weights A_k = W_k @ X
    b_ref:    (Co, 1)       f32   bias
    o_ref:    (Co, TQ)            output tile
    acc_ref:  (Co, TQ)      f32   VMEM accumulator
    """
    hw = h * w
    tq = base_ref.shape[1]

    # Static pixel-column indices generated in-kernel (no (HW, 2) grid input);
    # pixel-row indices come from the tiny (H,1,1) constant so ty is born in
    # its broadcast-ready (H, 1, TQ) shape without any relayout.
    w_ids = lax.broadcasted_iota(jnp.int32, (w, 1), 0).astype(jnp.float32)
    h_ids = hrow_ref[...]                                        # (H, 1, 1)

    base_y = base_ref[0:1, :]                                    # (1, TQ)
    base_x = base_ref[1:2, :]

    acc_ref[...] = jnp.zeros_like(acc_ref)

    def _tap(i, j):
        k = i * kw + j
        off = off_ref[k]                                         # (2, TQ)
        py = base_y + i.astype(jnp.float32) * dil_h + off[0:1, :]
        px = base_x + j.astype(jnp.float32) * dil_w + off[1:2, :]
        # Separable bilinear tents; zero outside the image reproduces
        # torchvision's zero-padded bilinear interpolation exactly.
        ty = jnp.maximum(0.0, 1.0 - jnp.abs(py[None] - h_ids))   # (H, 1, TQ)
        tx = jnp.maximum(0.0, 1.0 - jnp.abs(px - w_ids))         # (W, TQ)
        # Dense tent = one broadcast multiply; (H, W, TQ) -> (HW, TQ) is a
        # free retiling when W % 8 == 0.
        # TODO(synk): add a dense-tent fallback for images with W % 8 != 0.
        interp = (ty * tx[None]).reshape(hw, tq).astype(matmul_dtype)
        # out[o, q] += sum_hw A_k[o, hw] * tent_k[hw, q]   (MXU: M=Cout, K=HW)
        acc_ref[...] += jnp.dot(a_ref[k], interp,
                                preferred_element_type=jnp.float32)

    def _row(i, carry):
        def _col(j, c):
            _tap(i, j)
            return c
        return lax.fori_loop(0, kw, _col, carry)

    lax.fori_loop(0, kh, _row, 0)        # bounded live ranges across the taps

    o_ref[...] = (acc_ref[...] + b_ref[...]).astype(o_ref.dtype)


# ----------------------------------------------------------------------------
# Wrapper (plain JAX / numpy glue: reassociated weights + tiny base grid).
# ----------------------------------------------------------------------------
def deform_conv2d_pallas(x, offset, weight, bias, stride, padding, dilation, *,
                         matmul_dtype=jnp.float32, max_tq=1024):
    N, C, H, W = x.shape
    Co, Cg, KH, KW = weight.shape
    assert Cg == C, "groups must be 1"  # TODO(synk): grouped deform conv not implemented
    sh, sw = stride
    ph, pw = padding
    dh, dw = dilation
    Ho = (H + 2 * ph - (dh * (KH - 1) + 1)) // sh + 1
    Wo = (W + 2 * pw - (dw * (KW - 1) + 1)) // sw + 1
    K = KH * KW
    Q = Ho * Wo
    HW = H * W
    assert offset.shape == (N, 2 * K, Ho, Wo)

    op_bytes = np.dtype(matmul_dtype).itemsize
    vmem_limit = _vmem_limit_bytes()
    TQ = _choose_q_tile(Q, HW, H, W, K, Co, op_bytes, vmem_limit, max_tq)
    nq = -(-Q // TQ)
    Qp = nq * TQ

    # Reassociated per-tap weights applied to the image:
    #   A[n, k, o, :] = sum_c weight[o, c, k] * x[n, c, :]
    # Lifts the MXU M dimension from Cin to Cout; removes the sampled-tap
    # scratch and the second fused matmul of the direct formulation.
    x2 = x.reshape(N, C, HW).astype(jnp.float32)
    w2 = weight.astype(jnp.float32).reshape(Co, C, K)
    a = jnp.einsum("ock,nch->nkoh", w2, x2).astype(matmul_dtype)  # (N,K,Co,HW)

    # Raw learned offsets, lane-dense (no full-size base add in the wrapper);
    # padded columns (>= Q) compute finite garbage and are sliced off below.
    off = offset.reshape(N, K, 2, Q).astype(jnp.float32)
    if Qp > Q:
        off = jnp.pad(off, ((0, 0), (0, 0), (0, 0), (0, Qp - Q)))

    # Tiny per-column base grid (2, Qp) and per-row pixel indices (H, 1, 1).
    q_idx = np.arange(Qp)
    ho = np.minimum(q_idx // Wo, Ho - 1)
    wo = q_idx % Wo
    base = jnp.asarray(np.stack([ho * sh - ph, wo * sw - pw]).astype(np.float32))
    hrow = jnp.asarray(np.arange(H, dtype=np.float32).reshape(H, 1, 1))

    if bias is None:
        bias = jnp.zeros((Co,), jnp.float32)
    b2 = bias.reshape(Co, 1).astype(jnp.float32)

    # Grid ordering: keep the per-image A block resident across Q tiles when
    # N > 1; lead with the Q axis when N == 1 so it can be megacore-sharded.
    if N == 1:
        grid = (nq, N)
        n_of = lambda g: g[1]
        q_of = lambda g: g[0]
    else:
        grid = (N, nq)
        n_of = lambda g: g[0]
        q_of = lambda g: g[1]

    kernel = functools.partial(
        _deform_conv_kernel, kh=KH, kw=KW, dil_h=dh, dil_w=dw, h=H, w=W,
        matmul_dtype=matmul_dtype)

    out = pl.pallas_call(
        kernel,
        out_shape=jax.ShapeDtypeStruct((N, Co, Qp), jnp.float32),
        grid_spec=pltpu.PrefetchScalarGridSpec(
            num_scalar_prefetch=0,
            grid=grid,
            in_specs=[
                pl.BlockSpec((2, TQ), lambda *g: (0, q_of(g))),
                pl.BlockSpec((H, 1, 1), lambda *g: (0, 0, 0)),
                pl.BlockSpec((None, K, 2, TQ),
                             lambda *g: (n_of(g), 0, 0, q_of(g))),
                pl.BlockSpec((None, K, Co, HW),
                             lambda *g: (n_of(g), 0, 0, 0)),
                pl.BlockSpec((Co, 1), lambda *g: (0, 0)),
            ],
            out_specs=pl.BlockSpec((None, Co, TQ),
                                   lambda *g: (n_of(g), 0, q_of(g))),
            scratch_shapes=[pltpu.VMEM((Co, TQ), jnp.float32)],
        ),
        compiler_params=pltpu.CompilerParams(
            dimension_semantics=("parallel", "parallel"),
            vmem_limit_bytes=vmem_limit),
    )(base, hrow, off, a, b2)

    return out[:, :, :Q].reshape(N, Co, Ho, Wo)


# ----------------------------------------------------------------------------
# Module mirror of the PyTorch class.
# ----------------------------------------------------------------------------
class DeformConvWithChangeableStride:
    def __init__(self, in_channels, out_channels, kernel_size, padding=0,
                 dilation=1, groups=1, deformable_groups=1, bias=False,
                 norm=None, activation=None, *, key=None):
        assert in_channels % groups == 0
        assert out_channels % groups == 0
        assert deformable_groups == 1, "deformable_groups can only be 1"
        assert groups == 1  # TODO(synk): grouped deform conv not implemented in kernel
        self.in_channels = in_channels
        self.out_channels = out_channels
        self.kernel_size = _pair(kernel_size)
        self.padding = _pair(padding)
        self.dilation = _pair(dilation)
        self.groups = groups
        self.norm = norm
        self.activation = activation

        kh, kw = self.kernel_size
        fan_in = (in_channels // groups) * kh * kw
        bound = math.sqrt(6.0 / fan_in)      # kaiming_uniform_, relu gain sqrt(2)
        if key is None:
            key = jax.random.PRNGKey(0)
        self.weight = jax.random.uniform(
            key, (out_channels, in_channels // groups, kh, kw),
            jnp.float32, minval=-bound, maxval=bound)
        # The PyTorch __init__ constant-initialises bias to 0.
        self.bias = jnp.zeros((out_channels,), jnp.float32)

    def __call__(self, x, offset, stride, *, matmul_dtype=jnp.float32,
                 max_tq=1024):
        stride = _pair(stride)
        y = deform_conv2d_pallas(x, offset, self.weight, self.bias,
                                 stride, self.padding, self.dilation,
                                 matmul_dtype=matmul_dtype, max_tq=max_tq)
        if self.norm is not None:
            y = self.norm(y)
        if self.activation is not None:
            y = self.activation(y)
        return y


# ----------------------------------------------------------------------------
# Independent numpy reference (explicit zero-padded bilinear gather).
# ----------------------------------------------------------------------------
def _reference_deform_conv(x, offset, weight, bias, stride, padding, dilation):
    N, C, H, W = x.shape
    Co, _, KH, KW = weight.shape
    sh, sw = stride
    ph, pw = padding
    dh, dw = dilation
    Ho = (H + 2 * ph - (dh * (KH - 1) + 1)) // sh + 1
    Wo = (W + 2 * pw - (dw * (KW - 1) + 1)) // sw + 1
    x = x.astype(np.float64)
    offset = offset.astype(np.float64)
    weight = weight.astype(np.float64)
    out = np.zeros((N, Co, Ho, Wo), np.float64)
    for n in range(N):
        for i in range(KH):
            for j in range(KW):
                k = i * KW + j
                dy = offset[n, 2 * k]
                dx = offset[n, 2 * k + 1]
                py = np.arange(Ho)[:, None] * sh - ph + i * dh + dy
                px = np.arange(Wo)[None, :] * sw - pw + j * dw + dx
                y0 = np.floor(py)
                x0 = np.floor(px)
                ly = py - y0
                lx = px - x0
                val = np.zeros((C, Ho, Wo), np.float64)
                for yy, wy in ((y0, 1.0 - ly), (y0 + 1.0, ly)):
                    for xx, wx in ((x0, 1.0 - lx), (x0 + 1.0, lx)):
                        yi = yy.astype(np.int64)
                        xi = xx.astype(np.int64)
                        valid = (yi >= 0) & (yi < H) & (xi >= 0) & (xi < W)
                        yc = np.clip(yi, 0, H - 1)
                        xc = np.clip(xi, 0, W - 1)
                        v = x[n][:, yc, xc] * valid[None].astype(np.float64)
                        val += v * (wy * wx)[None]
                out[n] += np.einsum('oc,cpq->opq', weight[:, :, i, j], val)
    out += bias.reshape(1, Co, 1, 1)
    return out


if __name__ == "__main__":
    key = jax.random.PRNGKey(0)
    kx, koff, kw_, kx2, koff2, kx3, koff3 = jax.random.split(key, 7)

    # ---- config 1: small strided case (Q padded up to one 128-wide tile) ----
    N, C, H, W = 2, 4, 16, 16
    Co, KH, KW = 8, 3, 3
    padding, dilation, stride = 1, 1, 2
    Ho = (H + 2 * padding - (dilation * (KH - 1) + 1)) // stride + 1
    Wo = (W + 2 * padding - (dilation * (KW - 1) + 1)) // stride + 1

    x = jax.random.normal(kx, (N, C, H, W), jnp.float32)
    offset = 2.0 * jax.random.normal(koff, (N, 2 * KH * KW, Ho, Wo), jnp.float32)

    conv = DeformConvWithChangeableStride(C, Co, (KH, KW), padding=padding,
                                          dilation=dilation, bias=True, key=kw_)

    out = jax.block_until_ready(conv(x, offset, stride))
    ref = _reference_deform_conv(np.asarray(x), np.asarray(offset),
                                 np.asarray(conv.weight), np.asarray(conv.bias),
                                 (stride, stride), (padding, padding),
                                 (dilation, dilation))
    assert out.shape == (N, Co, Ho, Wo), out.shape
    np.testing.assert_allclose(np.asarray(out), ref, rtol=1e-3, atol=1e-3)

    # bf16 MXU-operand path (f32 tents / f32 accumulate), looser tolerance.
    out_bf16 = jax.block_until_ready(conv(x, offset, stride,
                                          matmul_dtype=jnp.bfloat16))
    np.testing.assert_allclose(np.asarray(out_bf16), ref, rtol=5e-2, atol=5e-2)

    # ---- config 2: larger output, several Q tiles (max_tq forces nq > 1) ----
    H2 = W2 = 32
    stride2 = 1
    Ho2 = (H2 + 2 * padding - (dilation * (KH - 1) + 1)) // stride2 + 1
    Wo2 = (W2 + 2 * padding - (dilation * (KW - 1) + 1)) // stride2 + 1
    x2 = jax.random.normal(kx2, (N, C, H2, W2), jnp.float32)
    offset2 = 2.0 * jax.random.normal(koff2, (N, 2 * KH * KW, Ho2, Wo2),
                                      jnp.float32)
    out2 = jax.block_until_ready(conv(x2, offset2, stride2, max_tq=512))
    ref2 = _reference_deform_conv(np.asarray(x2), np.asarray(offset2),
                                  np.asarray(conv.weight), np.asarray(conv.bias),
                                  (stride2, stride2), (padding, padding),
                                  (dilation, dilation))
    assert out2.shape == (N, Co, Ho2, Wo2), out2.shape
    np.testing.assert_allclose(np.asarray(out2), ref2, rtol=1e-3, atol=1e-3)

    # ---- config 3: N == 1 (Q-leading grid) + ragged Q that gets padded -------
    H3 = W3 = 24
    stride3 = 1
    Ho3 = (H3 + 2 * padding - (dilation * (KH - 1) + 1)) // stride3 + 1
    Wo3 = (W3 + 2 * padding - (dilation * (KW - 1) + 1)) // stride3 + 1
    x3 = jax.random.normal(kx3, (1, C, H3, W3), jnp.float32)
    offset3 = 2.0 * jax.random.normal(koff3, (1, 2 * KH * KW, Ho3, Wo3),
                                      jnp.float32)
    out3 = jax.block_until_ready(conv(x3, offset3, stride3))
    ref3 = _reference_deform_conv(np.asarray(x3), np.asarray(offset3),
                                  np.asarray(conv.weight), np.asarray(conv.bias),
                                  (stride3, stride3), (padding, padding),
                                  (dilation, dilation))
    assert out3.shape == (1, Co, Ho3, Wo3), out3.shape
    np.testing.assert_allclose(np.asarray(out3), ref3, rtol=1e-3, atol=1e-3)

    print("KERNEL_OK")
</pallas_src>

<mosaic_0001>
module attributes {stable_mosaic.version = 11 : i64} {
  func.func @_deform_conv_kernel(%arg0: i32, %arg1: i32, %arg2: memref<2x128xf32, #tpu.memory_space<vmem>>, %arg3: memref<16x1x1xf32, #tpu.memory_space<vmem>>, %arg4: memref<1x9x2x128xf32, #tpu.memory_space<vmem>>, %arg5: memref<1x9x8x256xf32, #tpu.memory_space<vmem>>, %arg6: memref<8x1xf32, #tpu.memory_space<vmem>>, %arg7: memref<1x8x128xf32, #tpu.memory_space<vmem>>, %arg8: memref<8x128xf32, #tpu.memory_space<vmem>>) attributes {dimension_semantics = [#tpu.dimension_semantics<parallel>, #tpu.dimension_semantics<parallel>], iteration_bounds = array<i64: 2, 1>, scalar_prefetch = 0 : i64, scratch_operands = 1 : i64, tpu.core_type = #tpu.core_type<tc>, window_params = [{transform_indices = @transform_0, window_bounds = array<i64: 2, 128>}, {pipeline_mode = #tpu.pipeline_mode<synchronous>, transform_indices = @transform_1, window_bounds = array<i64: 16, 1, 1>}, {transform_indices = @transform_2, window_bounds = array<i64: 1, 9, 2, 128>}, {transform_indices = @transform_3, window_bounds = array<i64: 1, 9, 8, 256>}, {pipeline_mode = #tpu.pipeline_mode<synchronous>, transform_indices = @transform_4, window_bounds = array<i64: 8, 1>}, {transform_indices = @transform_5, window_bounds = array<i64: 1, 8, 128>}]} {
    %0 = tpu.iota {dimensions = array<i32: 0>} : vector<16x1xi32>
    %1 = arith.sitofp %0 : vector<16x1xi32> to vector<16x1xf32>
    %c0 = arith.constant 0 : index
    %c0_0 = arith.constant 0 : index
    %c0_1 = arith.constant 0 : index
    %2 = vector.load %arg3[%c0, %c0_0, %c0_1] : memref<16x1x1xf32, #tpu.memory_space<vmem>>, vector<16x1x1xf32>
    %c0_2 = arith.constant 0 : index
    %c0_3 = arith.constant 0 : index
    %3 = vector.load %arg2[%c0_2, %c0_3] : memref<2x128xf32, #tpu.memory_space<vmem>>, vector<1x128xf32>
    %c1 = arith.constant 1 : index
    %c0_4 = arith.constant 0 : index
    %4 = vector.load %arg2[%c1, %c0_4] : memref<2x128xf32, #tpu.memory_space<vmem>>, vector<1x128xf32>
    %cst = arith.constant 0.000000e+00 : f32
    %5 = vector.broadcast %cst : f32 to vector<8x128xf32>
    %c0_5 = arith.constant 0 : index
    %c0_6 = arith.constant 0 : index
    %6 = vector.load %arg8[%c0_5, %c0_6] : memref<8x128xf32, #tpu.memory_space<vmem>>, vector<8x128xf32>
    tpu.vector_store %arg8[%c0_5, %c0_6], %5 {strides = array<i32>} : memref<8x128xf32, #tpu.memory_space<vmem>>, vector<8x128xf32>,
    %c0_i32 = arith.constant 0 : i32
    %c3_i32 = arith.constant 3 : i32
    %7 = arith.addi %c0_i32, %c3_i32 : i32
    %c1_i32 = arith.constant 1 : i32
    scf.for %arg9 = %c0_i32 to %7 step %c1_i32  : i32 {
      %c0_i32_15 = arith.constant 0 : i32
      %c3_i32_16 = arith.constant 3 : i32
      %15 = arith.addi %c0_i32_15, %c3_i32_16 : i32
      %c1_i32_17 = arith.constant 1 : i32
      scf.for %arg10 = %c0_i32_15 to %15 step %c1_i32_17  : i32 {
        %c3_i32_19 = arith.constant 3 : i32
        %16 = arith.muli %arg9, %c3_i32_19 : i32
        %17 = arith.addi %16, %arg10 : i32
        %c0_20 = arith.constant 0 : index
        %18 = arith.index_cast %17 : i32 to index
        %c0_21 = arith.constant 0 : index
        %c0_22 = arith.constant 0 : index
        %19 = vector.load %arg4[%c0_20, %18, %c0_21, %c0_22] : memref<1x9x2x128xf32, #tpu.memory_space<vmem>>, vector<1x1x2x128xf32>
        %20 = vector.shape_cast %19 : vector<1x1x2x128xf32> to vector<2x128xf32>
        %21 = arith.sitofp %arg9 : i32 to f32
        %cst_23 = arith.constant 1.000000e+00 : f32
        %22 = arith.mulf %21, %cst_23 : f32
        %23 = vector.broadcast %22 : f32 to vector<1x128xf32>
        %24 = arith.addf %3, %23 : vector<1x128xf32>
        %25 = vector.extract_strided_slice %20 {offsets = [0, 0], sizes = [1, 128], strides = [1, 1]} : vector<2x128xf32> to vector<1x128xf32>
        %26 = arith.addf %24, %25 : vector<1x128xf32>
        %27 = arith.sitofp %arg10 : i32 to f32
        %cst_24 = arith.constant 1.000000e+00 : f32
        %28 = arith.mulf %27, %cst_24 : f32
        %29 = vector.broadcast %28 : f32 to vector<1x128xf32>
        %30 = arith.addf %4, %29 : vector<1x128xf32>
        %31 = vector.extract_strided_slice %20 {offsets = [1, 0], sizes = [1, 128], strides = [1, 1]} : vector<2x128xf32> to vector<1x128xf32>
        %32 = arith.addf %30, %31 : vector<1x128xf32>
        %33 = vector.shape_cast %26 : vector<1x128xf32> to vector<1x1x128xf32>
        %34 = vector.broadcast %33 : vector<1x1x128xf32> to vector<16x1x128xf32>
        %35 = vector.broadcast %2 : vector<16x1x1xf32> to vector<16x1x128xf32>
        %36 = arith.subf %34, %35 : vector<16x1x128xf32>
        %37 = math.absf %36 : vector<16x1x128xf32>
        %cst_25 = arith.constant 1.000000e+00 : f32
        %38 = vector.broadcast %cst_25 : f32 to vector<16x1x128xf32>
        %39 = arith.subf %38, %37 : vector<16x1x128xf32>
        %cst_26 = arith.constant 0.000000e+00 : f32
        %40 = vector.broadcast %cst_26 : f32 to vector<16x1x128xf32>
        %41 = arith.maximumf %40, %39 : vector<16x1x128xf32>
        %42 = vector.broadcast %32 : vector<1x128xf32> to vector<16x128xf32>
        %43 = vector.broadcast %1 : vector<16x1xf32> to vector<16x128xf32>
        %44 = arith.subf %42, %43 : vector<16x128xf32>
        %45 = math.absf %44 : vector<16x128xf32>
        %cst_27 = arith.constant 1.000000e+00 : f32
        %46 = vector.broadcast %cst_27 : f32 to vector<16x128xf32>
        %47 = arith.subf %46, %45 : vector<16x128xf32>
        %cst_28 = arith.constant 0.000000e+00 : f32
        %48 = vector.broadcast %cst_28 : f32 to vector<16x128xf32>
        %49 = arith.maximumf %48, %47 : vector<16x128xf32>
        %50 = vector.shape_cast %49 : vector<16x128xf32> to vector<1x16x128xf32>
        %51 = vector.broadcast %41 : vector<16x1x128xf32> to vector<16x16x128xf32>
        %52 = vector.broadcast %50 : vector<1x16x128xf32> to vector<16x16x128xf32>
        %53 = arith.mulf %51, %52 : vector<16x16x128xf32>
        %54 = vector.shape_cast %53 : vector<16x16x128xf32> to vector<256x128xf32>
        %c0_29 = arith.constant 0 : index
        %c0_30 = arith.constant 0 : index
        %55 = vector.load %arg8[%c0_29, %c0_30] : memref<8x128xf32, #tpu.memory_space<vmem>>, vector<8x128xf32>
        %c0_31 = arith.constant 0 : index
        %56 = arith.index_cast %17 : i32 to index
        %c0_32 = arith.constant 0 : index
        %c0_33 = arith.constant 0 : index
        %57 = vector.load %arg5[%c0_31, %56, %c0_32, %c0_33] : memref<1x9x8x256xf32, #tpu.memory_space<vmem>>, vector<1x1x8x256xf32>
        %58 = vector.shape_cast %57 : vector<1x1x8x256xf32> to vector<8x256xf32>
        %cst_34 = arith.constant dense<0.000000e+00> : vector<8x128xf32>
        %59 = tpu.matmul %58, %54, %cst_34 {dimension_numbers = #tpu.dot_dimension_numbers<[1], [0], [0], [1], [0, 0, 1, 1], [], []>} : vector<8x256xf32>, vector<256x128xf32>, vector<8x128xf32> -> vector<8x128xf32>
        %60 = arith.addf %55, %59 : vector<8x128xf32>
        %c0_35 = arith.constant 0 : index
        %c0_36 = arith.constant 0 : index
        %61 = vector.load %arg8[%c0_35, %c0_36] : memref<8x128xf32, #tpu.memory_space<vmem>>, vector<8x128xf32>
        tpu.vector_store %arg8[%c0_35, %c0_36], %60 {strides = array<i32>} : memref<8x128xf32, #tpu.memory_space<vmem>>, vector<8x128xf32>,
      }
      %c3_i32_18 = arith.constant 3 : i32
    }
    %c3_i32_7 = arith.constant 3 : i32
    %c0_8 = arith.constant 0 : index
    %c0_9 = arith.constant 0 : index
    %8 = vector.load %arg8[%c0_8, %c0_9] : memref<8x128xf32, #tpu.memory_space<vmem>>, vector<8x128xf32>
    %c0_10 = arith.constant 0 : index
    %c0_11 = arith.constant 0 : index
    %9 = vector.load %arg6[%c0_10, %c0_11] : memref<8x1xf32, #tpu.memory_space<vmem>>, vector<8x1xf32>
    %10 = vector.broadcast %9 : vector<8x1xf32> to vector<8x128xf32>
    %11 = arith.addf %8, %10 : vector<8x128xf32>
    %c0_12 = arith.constant 0 : index
    %c0_13 = arith.constant 0 : index
    %c0_14 = arith.constant 0 : index
    %12 = vector.load %arg7[%c0_12, %c0_13, %c0_14] : memref<1x8x128xf32, #tpu.memory_space<vmem>>, vector<1x8x128xf32>
    %13 = vector.shape_cast %12 : vector<1x8x128xf32> to vector<8x128xf32>
    %14 = vector.shape_cast %11 : vector<8x128xf32> to vector<1x8x128xf32>
    tpu.vector_store %arg7[%c0_12, %c0_13, %c0_14], %14 {strides = array<i32>} : memref<1x8x128xf32, #tpu.memory_space<vmem>>, vector<1x8x128xf32>,
    return
  }
  func.func @transform_0(%arg0: i32, %arg1: i32) -> (i32, i32) {
    %c0_i32 = arith.constant 0 : i32
    %c0_i32_0 = arith.constant 0 : i32
    return %c0_i32, %arg1 : i32, i32
  }
  func.func @transform_1(%arg0: i32, %arg1: i32) -> (i32, i32, i32) {
    %c0_i32 = arith.constant 0 : i32
    %c0_i32_0 = arith.constant 0 : i32
    %c0_i32_1 = arith.constant 0 : i32
    %c0_i32_2 = arith.constant 0 : i32
    return %c0_i32, %c0_i32_0, %c0_i32_1 : i32, i32, i32
  }
  func.func @transform_2(%arg0: i32, %arg1: i32) -> (i32, i32, i32, i32) {
    %c0_i32 = arith.constant 0 : i32
    %c0_i32_0 = arith.constant 0 : i32
    %c0_i32_1 = arith.constant 0 : i32
    return %arg0, %c0_i32, %c0_i32_0, %arg1 : i32, i32, i32, i32
  }
  func.func @transform_3(%arg0: i32, %arg1: i32) -> (i32, i32, i32, i32) {
    %c0_i32 = arith.constant 0 : i32
    %c0_i32_0 = arith.constant 0 : i32
    %c0_i32_1 = arith.constant 0 : i32
    %c0_i32_2 = arith.constant 0 : i32
    return %arg0, %c0_i32, %c0_i32_0, %c0_i32_1 : i32, i32, i32, i32
  }
  func.func @transform_4(%arg0: i32, %arg1: i32) -> (i32, i32) {
    %c0_i32 = arith.constant 0 : i32
    %c0_i32_0 = arith.constant 0 : i32
    %c0_i32_1 = arith.constant 0 : i32
    return %c0_i32, %c0_i32_0 : i32, i32
  }
  func.func @transform_5(%arg0: i32, %arg1: i32) -> (i32, i32, i32) {
    %c0_i32 = arith.constant 0 : i32
    %c0_i32_0 = arith.constant 0 : i32
    return %arg0, %c0_i32, %arg1 : i32, i32, i32
  }
}

</mosaic_0001>

<bundles_post_ra>
// kernel: tpu_custom_call.1
= control target key start
LH: loop header
LB: loop body
LE: loop exit
PB: predicated region body
PF: predicated region fallthrough
CT: control target
= control target key end

     0   :  { %s1472_s0 = inlined_call_operand.vmem [shape: f32[2,128], index: 0, kind: input, shape index: {}]   ;;  %s1473_s1 = inlined_call_operand.vmem [shape: f32[16,1,1], index: 1, kind: input, shape index: {}]   ;;  %s1474_s2 = inlined_call_operand.hbm [shape: f32[2,9,2,128], index: 2, kind: input, shape index: {}]   ;;  %s1475_s3 = inlined_call_operand.hbm [shape: f32[2,9,8,256], index: 3, kind: input, shape index: {}]   ;;  %s1476_s4 = inlined_call_operand.vmem [shape: f32[8,1], index: 4, kind: input, shape index: {}]   ;;  %s1477_s5 = inlined_call_operand.hbm [shape: f32[2,8,128], index: 5, kind: output, shape index: {}]  }
   0x1   :  { %1480 = sst [smem:[#allocation15_spill]] %s1474_s2 }
   0x2   :  { %10 = vsyncpa [#allocation4], 0 }
   0x3   :  { %12 = vsyncpa [#allocation4 + $0x1], 0 }
   0x4   :  { %13 = vsyncpa [#allocation7], 0 }
   0x5   :  { %15 = vsyncpa [#allocation7 + $0x1], 0 }
   0x6   :  { %16 = vsyncpa [#allocation5], 0 }
   0x7   :  { %18 = vsyncpa [#allocation5 + $0x1], 0  ;;  %s1117_s18 = smov 0   ;;  %s1119_s19 = smov 0  }
   0x8   :  { %s1121_s20 = smov 0   ;;  %s1123_s21 = smov 0  }
   0x9   :  { %s1125_s22 = smov 0   ;;  %s1127_s23 = smov 0  }
   0xa LB: > { %1481 = sst [smem:[#allocation12_spill]] %s1058_s20  ;;  %s800_s24 = sadd.s32 4294967295, %s1070_s23   ;;  %s1070_s23 = sphi %s1127_s23, %s24_s23   ;;  %s1066_s22 = sphi %s1125_s22, %s1497_s22   ;;  %s1062_s21 = sphi %s1123_s21, %s1496_s21   ;;  %s1058_s20 = sphi %s1121_s20, %s1495_s20   ;;  %s1054_s19 = sphi %s1119_s19, %s1494_s19   ;;  %s1050_s18 = sphi %s1117_s18, %s1493_s18  }
   0xb   : > { %s801_s25 = sadd.s32 4294967294, %s1070_s23   ;;  %s36_s26 = sadd.s32 1, %s1066_s22 }
   0xc   : > { %s92_s27 = sadd.s32 1, %s1058_s20  ;;  %p38_p0 = scmp.ge.s32.totalorder %s36_s26, 2 }
   0xd   : > { %p99_p1 = scmp.ne.s32.totalorder %s1058_s20, %s1054_s19  ;;  %p100_p2 = scmp.eq.s32.totalorder %s1070_s23, 0 }
   0xe   : > { %p105_p3 = scmp.ne.s32.totalorder %s1054_s19, %s1050_s18  ;;  %s1499_s26 = smov (%p38_p0, %s36_s26), 0 }
   0xf   : > { %1482 = sst [smem:[#allocation13_spill]] %s1499_s26  ;;  %p1158_p4 = por %p100_p2, %p99_p1 }
  0x10   : > { %p106_p5 = scmp.eq.s32.totalorder %s800_s24, 0  ;;  %s87_s29 = ssub.s32 %s1066_s22, %s1499_s26 }
  0x11   : > { %p178_p6 = scmp.eq.s32.totalorder %s800_s24, 1  ;;  %p90_p7 = scmp.eq.s32.totalorder %s87_s29, 0 }
  0x12   : > { %p1164_p8 = por %p106_p5, %p105_p3  ;;  %p184_p10 = scmp.eq.s32.totalorder %s801_s25, 1 }
  0x13   : > { %p1168_p9 = por %p178_p6, %p99_p1  ;;  %p804_p12 = scmp.ge.s32.totalorder %s1070_s23, 2 }
  0x14   : > { %s1173_s7 = scalar_select %p90_p7, %s1058_s20, %s92_s27  }
  0x15   : > { %p1175_p11 = por %p184_p10, %p105_p3  ;;  %p839_p13 = scmp.lt.s32.totalorder %s1070_s23, 2 }
  0x16   : > { %1486 = sst [smem:[#allocation14_spill]] %s1173_s7  ;;  %s1182_s9 = sand.u32 1, %s1058_s20  }
  0x17   : > { %s816_s10 = smul.u32 18, %s1182_s9  ;;  %p1188_p0 = pnand %p839_p13, %p1158_p4 }
  0x18   : > { %s817_s11 = smul.u32 18, %s1066_s22  ;;  %s1489_s2 = sld [smem:[#allocation15_spill]] }
  0x19   : > { %s221_s16 = scalar_lea.vmem [#allocation3], %s816_s10  ;;  %p807_p1 = scmp.ge.s32.totalorder %s1070_s23, 1 }
  0x1a   : > { %s230_s17 = sshll.u32 %s221_s16, 4  ;;  %s218_s25 = scalar_lea.sflag [#allocation4], %s1182_s9  ;;  %s231_s17 = int_to_ptr.vmem [resolvable:$true] %s230_s17 }
  0x1b   : > { %s1080_s27 = smov 32   ;;  %s1081_s28 = smov 2  }
  0x1c   : > { %p260_p2 = scmp.lt.s32.totalorder %s1070_s23, 3  ;;  %s818_s29 = smul.u32 144, %s1182_s9 }
  0x1d   : > { %s819_s26 = smul.u32 144, %s1066_s22  ;;  %s1082_s7 = smov 256  }
  0x1e   : > { %s227_s15 = scalar_lea.hbm %s1489_s2, %s817_s11  ;;  %p261_p3 = pnand %p807_p1, %p260_p2 }
  0x1f   : > { %s228_s24 = sshll.u32 %s227_s15, 4  ;;  %s249_s10 = scalar_lea.hbm %s1475_s3, %s819_s26  ;;  %s229_s24 = int_to_ptr.hbm [resolvable:$true] %s228_s24 }
  0x20   : > { %831 = dma.hbm_to_vmem [thread:$0]  (!%p1188_p0), %s229_s24, 288, %s231_s17, %s218_s25, %s1080_s27, %s1080_s27, %s1081_s28  }
  0x21   : > { %s244_s11 = scalar_lea.vmem [#allocation6], %s818_s29  ;;  %s250_s16 = sshll.u32 %s249_s10, 4  ;;  %s251_s16 = int_to_ptr.hbm [resolvable:$true] %s250_s16 }
  0x22   : > { %s252_s15 = sshll.u32 %s244_s11, 4  ;;  %s241_s2 = scalar_lea.sflag [#allocation7], %s1182_s9  ;;  %s253_s15 = int_to_ptr.vmem [resolvable:$true] %s252_s15 }
  0x23   : > { %s1083_s20 = smov 16   ;;  %264 = sbr.rel (%p261_p3) target bundleno = 483 (0x1e3), region = 40 }
  0x24   : > { %834 = dma.hbm_to_vmem [thread:$0]  (!%p1188_p0), %s251_s16, 2304, %s253_s15, %s241_s2, %s1082_s7, %s1082_s7, %s1083_s20  }
  0x25   : > { %s1209_s17 = sand.u32 (!%p261_p3), 1, %s1054_s19  }
  0x26   : > { %s820_s24 = smul.u32 (!%p261_p3), 18, %s1209_s17  ;;  %s267_s25 = scalar_lea.sflag (!%p261_p3), [#allocation4], %s1209_s17 }
  0x28   : > { %s1213_s26 = scalar_lea.vmem [#allocation3], %s820_s24 }
  0x29   : > { %1037 = dma.done.wait (%p1164_p8), %s267_s25, 288  }
  0x2a   : > { %1039 = vsyncadd (%p1164_p8), %s267_s25, 4294967008  ;;  %s821_s2 = smul.u32 144, %s1209_s17  ;;  %s277_s20 = scalar_lea.sflag [#allocation7], %s1209_s17 }
  0x2c   : > { %s1221_s7 = scalar_lea.vmem [#allocation6], %s821_s2 }
  0x2d   : > { %1041 = dma.done.wait (%p1164_p8), %s277_s20, 2304  }
  0x2e   : > { %1043 = vsyncadd (%p1164_p8), %s277_s20, 4294964992  ;;  %s808_s9 = sshll.u32 %s1209_s17, 3  ;;  %v321_v0 = vlaneseq  ;;  %v1084_v1 = vmov 0.0   ;;  %v1238_v6 = vld [vmem:[%s1473_s1] sm:$0x1]  ;;  %s1327_s10 = smov 0  }
  0x2f   : > { %344 = vst [vmem:[#allocation2] sm:$0xff] %v1084_v1  ;;  %v1243_v7 = vld [vmem:[%s1473_s1 + $0x1] sm:$0x1]  ;;  %v1248_v8 = vld [vmem:[%s1473_s1 + $0x2] sm:$0x1]  ;;  %s1325_s14 = scalar_lea.vmem [#allocation8], %s808_s9 }
  0x30   : > { %v1228_v2 = vshrl.u32 %v321_v0, 7  ;;  %v1253_v9 = vld [vmem:[%s1473_s1 + $0x3] sm:$0x1]  ;;  %v1258_v10 = vld [vmem:[%s1473_s1 + $0x4] sm:$0x1] }
  0x31   : > { %v1263_v11 = vld [vmem:[%s1473_s1 + $0x5] sm:$0x1]  ;;  %v1268_v12 = vld [vmem:[%s1473_s1 + $0x6] sm:$0x1]  ;;  %v1273_v13 = vld [vmem:[%s1473_s1 + $0x7] sm:$0x1] }
  0x32   : > { %v1231_v3 = vadd.s32 8, %v1228_v2  ;;  %v324_v4 = vcvt.s32.f32 %v1228_v2  ;;  %v1278_v14 = vld [vmem:[%s1473_s1 + $0x8] sm:$0x1]  ;;  %v1283_v15 = vld [vmem:[%s1473_s1 + $0x9] sm:$0x1] }
  0x33   : > { %v1288_v16 = vld [vmem:[%s1473_s1 + $0xa] sm:$0x1]  ;;  %v1293_v17 = vld [vmem:[%s1473_s1 + $0xb] sm:$0x1]  ;;  %v1298_v18 = vld [vmem:[%s1473_s1 + $0xc] sm:$0x1] }
  0x34   : > { %v325_v5 = vcvt.s32.f32 %v1231_v3  ;;  %v1303_v19 = vld [vmem:[%s1473_s1 + $0xd] sm:$0x1]  ;;  %v1308_v20 = vld [vmem:[%s1473_s1 + $0xe] sm:$0x1]  ;;  %v1313_v21 = vld [vmem:[%s1473_s1 + $0xf] sm:$0x1] }
  0x35   : > { %v1318_v22 = vld [vmem:[%s1472_s0] sm:$0x1]  ;;  %v1323_v23 = vld [vmem:[%s1472_s0 + $0x1] sm:$0x1] }
  0x36 LB: >> { %s1332_s11 = smov 0   ;;  %s1074_s10 = sphi %s1327_s10, %s350_s10  }
  0x37 LB: >>> { %v1085_v24 = vmov 0   ;;  %s357_s9 = smul.u32 3, %s1074_s10  ;;  %s366_s24 = scvt.s32.f32 %s1078_s11  ;;  %s1078_s11 = sphi %s1332_s11, %s356_s11  }
  0x38   : >>> { %914 = vset.pattern.permute.xlu2 %v1085_v24  ;;  %913 = vset.pattern.permute.xlu1 %v1085_v24  ;;  %s362_s2 = scvt.s32.f32 %s1074_s10 }
  0x39   : >>> { %912 = vset.pattern.permute.xlu0 %v1085_v24  ;;  %405 = vperm.xlu2 %914, %v1263_v11   ;;  %s1355_s15 = sadd.s32 %s1078_s11, %s357_s9  ;;  %v367_v27 = vstv %s366_s24  ;;  %s356_s11 = sadd.s32 1, %s1078_s11  }
  0x3a   : >>> { %411 = vperm.xlu1 %913, %v1268_v12   ;;  %417 = vperm.xlu0 %912, %v1273_v13   ;;  %s809_s16 = sshll.u32 %s1355_s15, 1  ;;  %v368_v29 = vadd.f32 %v367_v27, %v1323_v23  ;;  %v363_v31 = vstv %s362_s2  ;;  %s815_s20 = sshll.u32 %s1355_s15, 4 }
  0x3b   : >>> { %s360_s25 = scalar_lea.vmem %s1213_s26, %s809_s16 [#allocation3]  ;;  %v364_v33 = vadd.f32 %v363_v31, %v1318_v22  ;;  %s592_s12 = scalar_lea.vmem %s1221_s7, %s815_s20 [#allocation6] }
  0x3c   : >>> { %v361_v26 = vld [vmem:[%s360_s25] sm:$0x3]  ;;  %p353_p4 = scmp.ge.s32.totalorder %s356_s11, 3  }
  0x3d   : >>> { %v370_v28 = vrot.slane %v361_v26, 1  ;;  %v1363_v36 = vadd.f32 %v364_v33, %v361_v26  ;;  %s350_s10 = sadd.s32 (%p353_p4), 1, %s1074_s10  }
  0x3e   : >> { %p347_p5 = scmp.ge.s32.totalorder (%p353_p4), %s350_s10, 3  }
  0x3f   : >>> { %v372_v30 = vadd.f32 %v370_v28, %v368_v29 }
  0x41   : >>> { %453 = vperm.xlu2 %914, %v1303_v19   ;;  %v533_v34 = vperm.slane %v372_v30, 0 }
  0x42   : >>> { %459 = vperm.xlu1 %913, %v1308_v20   ;;  %465 = vperm.xlu0 %912, %v1313_v21  }
  0x43   : >>> { %v535_v37 = vsub.f32 %v533_v34, %v325_v5  ;;  %v534_v39 = vsub.f32 %v533_v34, %v324_v4 }
  0x45   : >>> { %v537_v42 = vand.u32 2147483647, %v535_v37  ;;  %v536_v48 = vand.u32 2147483647, %v534_v39 }
  0x47   : >>> { %v539_v51 = vsub.f32 1.0, %v537_v42  ;;  %v538_v56 = vsub.f32 1.0, %v536_v48 }
  0x49   : >>> { %393 = vperm.xlu2 %914, %v1253_v9   ;;  %v1373_v62 = vmax.f32 %v539_v51, 0.0  ;;  %v1375_v26 = vmax.f32 %v538_v56, 0.0 }
  0x4a   : >>> { %447 = vperm.xlu1 %913, %v1298_v18   ;;  %399 = vperm.xlu0 %912, %v1258_v10  }
  0x51   : >>> { %435 = vperm.xlu2 %914, %v1288_v16  }
  0x52   : >>> { %387 = vperm.xlu1 %913, %v1248_v8   ;;  %441 = vperm.xlu0 %912, %v1293_v17  }
  0x59   : >>> { %375 = vperm.xlu2 %914, %v1238_v6  }
  0x5a   : >>> { %429 = vperm.xlu1 %913, %v1283_v15   ;;  %381 = vperm.xlu0 %912, %v1243_v7  }
  0x62   : >>> { %423 = vperm.xlu0 %912, %v1278_v14  }
  0x93   : >>> { %v406_v25 = vpop.permute.xlu2 %405 }
  0x94   : >>> { %v408_v35 = vperm.slane %v406_v25, 0 }
  0x96   : >>> { %v474_v38 = vsub.f32 %v1363_v36, %v408_v35 }
  0x98   : >>> { %v490_v46 = vand.u32 2147483647, %v474_v38 }
  0x9a   : >>> { %v506_v54 = vsub.f32 1.0, %v490_v46 }
  0x9b   : >>> { %v454_v32 = vpop.permute.xlu2 %453 }
  0x9c   : >>> { %v456_v47 = vperm.slane %v454_v32, 0  ;;  %v522_v27 = vmax.f32 %v506_v54, 0.0 }
  0x9e   : >>> { %v482_v55 = vsub.f32 %v1363_v36, %v456_v47  ;;  %v547_v39 = vperm.slane %v522_v27, 0 }
  0xa0   : >>> { %v498_v25 = vand.u32 2147483647, %v482_v55 }
  0xa2   : >>> { %v514_v38 = vsub.f32 1.0, %v498_v25 }
  0xa3   : >>> { %v394_v43 = vpop.permute.xlu2 %393 }
  0xa4   : >>> { %v396_v59 = vperm.slane %v394_v43, 0 }
  0xa6   : >>> { %v472_v33 = vsub.f32 %v1363_v36, %v396_v59 }
  0xab   : >>> { %v436_v28 = vpop.permute.xlu2 %435 }
  0xac   : >>> { %v412_v40 = vpop.permute.xlu1 %411  ;;  %v418_v41 = vpop.permute.xlu0 %417 }
  0xad   : >>> { %v414_v44 = vperm.slane %v412_v40, 0  ;;  %v420_v45 = vperm.slane %v418_v41, 0 }
  0xaf   : >>> { %v475_v49 = vsub.f32 %v1363_v36, %v414_v44  ;;  %v476_v50 = vsub.f32 %v1363_v36, %v420_v45  ;;  %v488_v44 = vand.u32 2147483647, %v472_v33  ;;  %v438_v45 = vperm.slane %v436_v28, 0 }
  0xb1   : >>> { %v491_v52 = vand.u32 2147483647, %v475_v49  ;;  %v492_v53 = vand.u32 2147483647, %v476_v50  ;;  %v479_v59 = vsub.f32 %v1363_v36, %v438_v45 }
  0xb3   : >>> { %v507_v57 = vsub.f32 1.0, %v491_v52  ;;  %v508_v58 = vsub.f32 1.0, %v492_v53  ;;  %v569_v52 = vmul.f32 %v547_v39, %v1373_v62  ;;  %v530_v53 = vmax.f32 %v514_v38, 0.0 }
  0xb4   : >>> { %v460_v60 = vpop.permute.xlu1 %459  ;;  %v466_v61 = vpop.permute.xlu0 %465 }
  0xb5   : >>> { %v462_v63 = vperm.slane %v460_v60, 0  ;;  %v468_v0 = vperm.slane %v466_v61, 0  ;;  %v524_v1 = vmax.f32 %v508_v58, 0.0  ;;  %v523_v24 = vmax.f32 %v507_v57, 0.0  ;;  %v376_v61 = vpop.permute.xlu2 %375 }
  0xb6   : >>> { %v504_v58 = vsub.f32 1.0, %v488_v44 }
  0xb7   : >>> { %v483_v29 = vsub.f32 %v1363_v36, %v462_v63  ;;  %v484_v30 = vsub.f32 %v1363_v36, %v468_v0  ;;  %v549_v31 = vperm.slane %v524_v1, 0  ;;  %v548_v32 = vperm.slane %v523_v24, 0 }
  0xb8   : >>> { %v568_v24 = vmul.f32 %v547_v39, %v1375_v26 }
  0xb9   : >>> { %v499_v34 = vand.u32 2147483647, %v483_v29  ;;  %v500_v35 = vand.u32 2147483647, %v484_v30  ;;  %v573_v37 = vmul.f32 %v549_v31, %v1373_v62  ;;  %v572_v41 = vmul.f32 %v549_v31, %v1375_v26 }
  0xba   : >>> { %v571_v42 = vmul.f32 %v548_v32, %v1373_v62  ;;  %v570_v56 = vmul.f32 %v548_v32, %v1375_v26  ;;  %v555_v29 = vperm.slane %v530_v53, 0  ;;  %v495_v30 = vand.u32 2147483647, %v479_v59 }
  0xbb   : >>> { %v515_v40 = vsub.f32 1.0, %v499_v34  ;;  %595 = vmatpush.msra.mxu0 %v573_v37  ;;  %v516_v43 = vsub.f32 1.0, %v500_v35  ;;  %v378_v31 = vperm.slane %v376_v61, 0  ;;  %v520_v35 = vmax.f32 %v504_v58, 0.0 }
  0xbc   : >>> { %v448_v46 = vpop.permute.xlu1 %447  ;;  %v400_v47 = vpop.permute.xlu0 %399  ;;  %v511_v45 = vsub.f32 1.0, %v495_v30 }
  0xbd   : >>> { %v450_v48 = vperm.slane %v448_v46, 0  ;;  %v402_v49 = vperm.slane %v400_v47, 0  ;;  %596 = vmatpush.msra.mxu0 %v572_v41  ;;  %v532_v50 = vmax.f32 %v516_v43, 0.0  ;;  %v531_v51 = vmax.f32 %v515_v40, 0.0 }
  0xbe   : >>> { %v469_v46 = vsub.f32 %v1363_v36, %v378_v31  ;;  %v545_v47 = vperm.slane %v520_v35, 0 }
  0xbf   : >>> { %v481_v54 = vsub.f32 %v1363_v36, %v450_v48  ;;  %v473_v55 = vsub.f32 %v1363_v36, %v402_v49  ;;  %597 = vmatpush.msra.mxu0 %v571_v42  ;;  %v557_v57 = vperm.slane %v532_v50, 0  ;;  %v556_v60 = vperm.slane %v531_v51, 0 }
  0xc1   : >>> { %v497_v63 = vand.u32 2147483647, %v481_v54  ;;  %v489_v0 = vand.u32 2147483647, %v473_v55  ;;  %598 = vmatpush.msra.mxu0 %v570_v56  ;;  %v589_v1 = vmul.f32 %v557_v57, %v1373_v62  ;;  %v588_v28 = vmul.f32 %v557_v57, %v1375_v26 }
  0xc2   : >>> { %v587_v34 = vmul.f32 %v556_v60, %v1373_v62  ;;  %v586_v43 = vmul.f32 %v556_v60, %v1375_v26  ;;  %v584_v56 = vmul.f32 %v555_v29, %v1375_v26  ;;  %v485_v57 = vand.u32 2147483647, %v469_v46 }
  0xc3   : >>> { %v513_v25 = vsub.f32 1.0, %v497_v63  ;;  %v505_v27 = vsub.f32 1.0, %v489_v0  ;;  %599 = vmatpush.msra.mxu0 %v569_v52  ;;  %615 = vmatpush.msra.mxu1 %v589_v1  ;;  %v585_v52 = vmul.f32 %v555_v29, %v1373_v62  ;;  %v565_v60 = vmul.f32 %v545_v47, %v1373_v62 }
  0xc4   : >>> { %v388_v32 = vpop.permute.xlu1 %387  ;;  %v442_v33 = vpop.permute.xlu0 %441  ;;  %v527_v63 = vmax.f32 %v511_v45, 0.0 }
  0xc5   : >>> { %v390_v37 = vperm.slane %v388_v32, 0  ;;  %v444_v38 = vperm.slane %v442_v33, 0  ;;  %600 = vmatpush.msra.mxu0 %v568_v24  ;;  %616 = vmatpush.msra.mxu1 %v588_v28  ;;  %v521_v40 = vmax.f32 %v505_v27, 0.0  ;;  %v529_v39 = vmax.f32 %v513_v25, 0.0 }
  0xc6   : >>> { %v564_v27 = vmul.f32 %v545_v47, %v1375_v26  ;;  %v501_v33 = vsub.f32 1.0, %v485_v57 }
  0xc7   : >>> { %v471_v41 = vsub.f32 %v1363_v36, %v390_v37  ;;  %v480_v42 = vsub.f32 %v1363_v36, %v444_v38  ;;  %617 = vmatpush.msra.mxu1 %v587_v34  ;;  %v546_v44 = vperm.slane %v521_v40, 0  ;;  %v554_v48 = vperm.slane %v529_v39, 0 }
  0xc8   : >>> { %v552_v34 = vperm.slane %v527_v63, 0  ;;  %v517_v46 = vmax.f32 %v501_v33, 0.0 }
  0xc9   : >>> { %v487_v49 = vand.u32 2147483647, %v471_v41  ;;  %v496_v50 = vand.u32 2147483647, %v480_v42  ;;  %618 = vmatpush.msra.mxu1 %v586_v43  ;;  %v567_v51 = vmul.f32 %v546_v44, %v1373_v62  ;;  %v566_v55 = vmul.f32 %v546_v44, %v1375_v26 }
  0xca   : >>> { %v583_v61 = vmul.f32 %v554_v48, %v1373_v62  ;;  %v582_v28 = vmul.f32 %v554_v48, %v1375_v26  ;;  %v579_v45 = vmul.f32 %v552_v34, %v1373_v62  ;;  %v542_v57 = vperm.slane %v517_v46, 0 }
  0xcb   : >>> { %v503_v53 = vsub.f32 1.0, %v487_v49  ;;  %v512_v54 = vsub.f32 1.0, %v496_v50  ;;  %601 = vmatpush.msra.mxu0 %v567_v51  ;;  %619 = vmatpush.msra.mxu1 %v585_v52  ;;  %v578_v51 = vmul.f32 %v552_v34, %v1375_v26 }
  0xcc   : >>> { %v430_v58 = vpop.permute.xlu1 %429  ;;  %v382_v59 = vpop.permute.xlu0 %381  ;;  %v558_v63 = vmul.f32 %v542_v57, %v1375_v26 }
  0xcd   : >>> { %v432_v0 = vperm.slane %v430_v58, 0  ;;  %v384_v1 = vperm.slane %v382_v59, 0  ;;  %602 = vmatpush.msra.mxu0 %v566_v55  ;;  %620 = vmatpush.msra.mxu1 %v584_v56  ;;  %v519_v24 = vmax.f32 %v503_v53, 0.0  ;;  %v528_v25 = vmax.f32 %v512_v54, 0.0 }
  0xcf   : >>> { %v478_v29 = vsub.f32 %v1363_v36, %v432_v0  ;;  %v470_v30 = vsub.f32 %v1363_v36, %v384_v1  ;;  %603 = vmatpush.msra.mxu0 %v565_v60  ;;  %621 = vmatpush.msra.mxu1 %v583_v61  ;;  %v544_v31 = vperm.slane %v519_v24, 0  ;;  %v553_v32 = vperm.slane %v528_v25, 0  ;;  %v593_v1 = vld [vmem:[%s592_s12] sm:$0xff] }
  0xd0   : >>> { %v559_v61 = vmul.f32 %v542_v57, %v1373_v62 }
  0xd1   : >>> { %v494_v35 = vand.u32 2147483647, %v478_v29  ;;  %v486_v37 = vand.u32 2147483647, %v470_v30  ;;  %604 = vmatpush.msra.mxu0 %v564_v27  ;;  %622 = vmatpush.msra.mxu1 %v582_v28  ;;  %v563_v38 = vmul.f32 %v544_v31, %v1373_v62  ;;  %v581_v40 = vmul.f32 %v553_v32, %v1373_v62  ;;  %v594_v27 = vld [vmem:[%s592_s12 + $0x8] sm:$0xff]  ;;  %v590_v29 = vld [vmem:[#allocation2] sm:$0xff] }
  0xd2   : >>> { %v562_v42 = vmul.f32 %v544_v31, %v1375_v26  ;;  %v580_v43 = vmul.f32 %v553_v32, %v1375_v26 }
  0xd3   : >>> { %v510_v39 = vsub.f32 1.0, %v494_v35  ;;  %v502_v41 = vsub.f32 1.0, %v486_v37  ;;  %605 = vmatpush.msra.mxu0 %v563_v38  ;;  %623 = vmatpush.msra.mxu1 %v581_v40 }
  0xd4   : >>> { %v424_v44 = vpop.permute.xlu0 %423 }
  0xd5   : >>> { %v526_v47 = vmax.f32 %v510_v39, 0.0  ;;  %v426_v48 = vperm.slane %v424_v44, 0  ;;  %606 = vmatpush.msra.mxu0 %v562_v42  ;;  %624 = vmatpush.msra.mxu1 %v580_v43  ;;  %v518_v49 = vmax.f32 %v502_v41, 0.0 }
  0xd7   : >>> { %v477_v50 = vsub.f32 %v1363_v36, %v426_v48  ;;  %625 = vmatpush.msra.mxu1 %v579_v45  ;;  %v543_v52 = vperm.slane %v518_v49, 0  ;;  %v551_v53 = vperm.slane %v526_v47, 0 }
  0xd9   : >>> { %v493_v54 = vand.u32 2147483647, %v477_v50  ;;  %626 = vmatpush.msra.mxu1 %v578_v51  ;;  %v561_v55 = vmul.f32 %v543_v52, %v1373_v62  ;;  %v577_v56 = vmul.f32 %v551_v53, %v1373_v62  ;;  %v560_v59 = vmul.f32 %v543_v52, %v1375_v26 }
  0xda   : >>> { %v576_v36 = vmul.f32 %v551_v53, %v1375_v26 }
  0xdb   : >>> { %v509_v58 = vsub.f32 1.0, %v493_v54  ;;  %607 = vmatpush.msra.mxu0 %v561_v55  ;;  %627 = vmatpush.msra.mxu1 %v577_v56 }
  0xdd   : >>> { %v525_v60 = vmax.f32 %v509_v58, 0.0  ;;  %608 = vmatpush.msra.mxu0 %v560_v59  ;;  %628 = vmatpush.msra.mxu1 %v576_v36 }
  0xdf   : >>> { %609 = vmatpush.msra.mxu0 %v559_v61  ;;  %v550_v0 = vperm.slane %v525_v60, 0 }
  0xe1   : >>> { %610 = vmatpush.msra.mxu0 %v558_v63  ;;  %v575_v24 = vmul.f32 %v550_v0, %v1373_v62  ;;  %v574_v25 = vmul.f32 %v550_v0, %v1375_v26 }
  0xe2   : >>> { %611 = vmatmul.f32.vlgmr.msra.gmra.mxu0 %v593_v1 }
  0xe3   : >>> { %629 = vmatpush.msra.mxu1 %v575_v24 }
  0xe5   : >>> { %630 = vmatpush.msra.mxu1 %v574_v25 }
  0xe6   : >>> { %631 = vmatmul.f32.vlgmr.msra.gmra.mxu1 %v594_v27 }
 0x15f   : >>> { %v612_v28 = vpop.f32.mrf.mxu0 }
 0x163   : >>> { %v632_v30 = vpop.f32.mrf.mxu1 }
 0x164   : >>> { %v633_v31 = vadd.f32 %v632_v30, %v612_v28  ;;  %355 = sbr.rel (!%p353_p4) target bundleno = 55 (0x37), region = 117 }
 0x166   : >>> { %v635_v32 = vadd.f32 %v633_v31, %v590_v29 }
 0x168   : >>> { %636 = vst [vmem:[#allocation2] sm:$0xff] %v635_v32 }
 0x169   : > { %349 = sbr.rel (!%p347_p5) target bundleno = 54 (0x36), region = 128  ;;  %v638_v62 = vld [vmem:[%s1476_s4] sm:$0xff] (%p347_p5)  ;;  %v1086_v26 = vmov (%p347_p5), 0   ;;  %s812_s28 = sshll.u32 (%p347_p5), %s1062_s21, 3 }
 0x16a   : > { %915 = vset.pattern.permute.xlu0 (%p347_p5), %v1086_v26  ;;  %s658_s11 = scalar_lea.hbm (%p347_p5), %s1477_s5, %s812_s28  ;;  %s660_s10 = sshll.u32 (%p347_p5), %s1325_s14, 4  ;;  %s661_s10 = int_to_ptr.vmem [resolvable:$true] %s660_s10 }
 0x16b   : > { %641 = vperm.xlu0 (%p347_p5), %915, %v638_v62   ;;  %s662_s9 = sshll.u32 (%p347_p5), %s658_s11, 4  ;;  %s647_s26 = scalar_lea.sflag (%p347_p5), [#allocation5], %s1209_s17  ;;  %s663_s9 = int_to_ptr.hbm [resolvable:$true] %s662_s9 }
 0x16c   : > { %s990_s7 = sshra.s32 (%p347_p5), %s663_s9, 4  ;;  %s996_s24 = scalar_lea.hbm (%p347_p5), %s1477_s5, 16  ;;  %s991_s7 = int_to_ptr.hbm [resolvable:$true] %s990_s7 }
 0x16d   : > { %s992_s15 = scalar_lea.hbm (%p347_p5), %s991_s7, 8  ;;  %p997_p10 = scmp.lt.s32.totalorder (%p347_p5), %s991_s7, %s1477_s5 }
 0x16e   : > { %p993_p6 = scmp.ne.s32.totalorder %s991_s7, %s992_s15  ;;  %p998_p13 = scmp.lt.s32.totalorder %s996_s24, %s992_s15 }
 0x16f   : > { %v637_v33 = vld [vmem:[#allocation2] sm:$0xff] }
 0x170   : > { %p994_p7 = pnand %p993_p6, %p1168_p9  ;;  %p999_p0 = por %p998_p13, %p997_p10 }
 0x172   : > { %p995_p8 = pneg %p994_p7 }
 0x174   : > { %p1000_p1 = pnand %p999_p0, %p995_p8 }
 0x1dd   : > { %v642_v2 = vpop.permute.xlu0 %641 }
 0x1de   : > { %v644_v3 = vadd.f32 %v642_v2, %v637_v33 }
 0x1e0   : > { %645 = vst [vmem:[%s1325_s14] sm:$0xff] %v644_v3 }
 0x1e1   : > { %1003 = shalt.err (!%p1000_p1)
}
 0x1e2   : > { %826 = dma.vmem_to_hbm [thread:$0]  (%p1168_p9), %s661_s10, 128, %s663_s9, %s647_s26  }
 0x1e3 PF: > { %s674_s17 = sand.u32 1, %s1050_s18   ;;  %p836_p2 = pnand %p804_p12, %p1175_p11 }
 0x1e4   : > { %s675_s14 = scalar_lea.sflag [#allocation5], %s674_s17 }
 0x1e5   : > { %p837_p3 = pneg %p836_p2 }
 0x1e7   : > { %1045 = dma.done.wait (%p837_p3), %s675_s14, 128  }
 0x1e8   : > { %1047 = vsyncadd (%p837_p3), %s675_s14, 4294967168  ;;  %s24_s23 = sadd.s32 1, %s1070_s23   ;;  %s1490_s20 = sld [smem:[#allocation12_spill]] }
 0x1e9   : > { %p21_p4 = scmp.ge.s32.totalorder %s24_s23, 4   ;;  %s1491_s12 = sld [smem:[#allocation14_spill]] }
 0x1ea   : > { %s1492_s6 = sld [smem:[#allocation13_spill]]  ;;  %s1493_s18 = smov %s1054_s19 }
 0x1eb   : > { %s1496_s21 = smov %s1066_s22 }
 0x1ec   :  { %23 = sbr.rel (!%p21_p4) target bundleno = 10 (0xa), region = 139 }
 0x1ee   : > { %s1494_s19 = smov %s1490_s20 }
 0x1ef   : > { %s1495_s20 = smov %s1491_s12 }
 0x1f0   : > { %s1497_s22 = smov %s1492_s6 }
 0x1f1   :  { %681 = vsyncpa [#allocation4], 1 }
 0x1f2   :  { %683 = vsyncpa [#allocation4 + $0x1], 1 }
 0x1f3   :  { %684 = vsyncpa [#allocation7], 1 }
 0x1f4   :  { %686 = vsyncpa [#allocation7 + $0x1], 1 }
 0x1f5   :  { %687 = vsyncpa [#allocation5], 1 }
 0x1f6   :  { %689 = vsyncpa [#allocation5 + $0x1], 1 }

</bundles_post_ra>
